<compile_context>
chip_gen: v5e
topology: v5e:2x2
jax: 0.10.0
libtpu: 0.0.40
codegen_flags: <defaults>
</compile_context>

<pallas_src>
import functools

import jax
import jax.numpy as jnp
from jax.experimental import pallas as pl
from jax.experimental.pallas import tpu as pltpu


# ----------------------------------------------------------------------------
# Stage 1: conditional affine parameters, computed once for ALL batch rows.
# ----------------------------------------------------------------------------
def _cond_affine_kernel(ce_ref, wh_ref, wg_ref, wb_ref, gma_ref, bta_ref,
                        gamma_ref, beta_ref):
    # hidden_activation defaults to 'linear' (None) in the module -> no activation.
    h = jnp.dot(ce_ref[...], wh_ref[...], preferred_element_type=jnp.float32)      # (bs, dim)
    gamma_ref[...] = gma_ref[...] + jnp.dot(h, wg_ref[...],
                                            preferred_element_type=jnp.float32)    # (bs, dim)
    beta_ref[...] = bta_ref[...] + jnp.dot(h, wb_ref[...],
                                           preferred_element_type=jnp.float32)     # (bs, dim)


def _cond_affine(cond_embed, w_hidden, w_gamma, w_beta, clngma, clnbta):
    bs = cond_embed.shape[0]
    dim = w_hidden.shape[1]
    # Whole-array default blocks; this runs exactly once (M=bs matmuls on MXU).
    return pl.pallas_call(
        _cond_affine_kernel,
        out_shape=(jax.ShapeDtypeStruct((bs, dim), jnp.float32),
                   jax.ShapeDtypeStruct((bs, dim), jnp.float32)),
    )(cond_embed, w_hidden, w_gamma, w_beta,
      clngma.reshape(1, dim), clnbta.reshape(1, dim))


# ----------------------------------------------------------------------------
# Stage 2: streaming kernel with fused word-embedding gather.
# ----------------------------------------------------------------------------
def _stream_kernel(tile, ids_ref, word_hbm, pos_ref, gamma_ref, beta_ref,
                   out_ref, buf, sems):
    b = pl.program_id(0)
    t = pl.program_id(1)
    base = t * tile

    # Gather `tile` word-embedding rows directly from the HBM table into VMEM.
    copies = []
    for r in range(tile):                       # tile is a static Python constant
        idx = ids_ref[b, base + r]              # scalar read from SMEM (prefetched ids)
        cp = pltpu.make_async_copy(word_hbm.at[pl.ds(idx, 1)],
                                   buf.at[pl.ds(r, 1)],
                                   sems.at[r])
        cp.start()
        copies.append(cp)
    for cp in copies:
        cp.wait()

    emb = buf[...] + pos_ref[...]                               # (tile, dim)
    # TODO(synk): cast to bf16 at the store if downstream accepts it (halves
    # store traffic; biggest relative win on v5e) — kept f32 to match reference.
    out_ref[...] = emb * gamma_ref[...] + beta_ref[...]         # broadcast (1, dim)


def _pick_row_tile(seq):
    # Prefer large row tiles (amortize ~0.35us per grid step / lane-dense vst),
    # capped so the per-step gather (one DMA + one semaphore per row) stays modest.
    for t in (256, 128, 64, 32, 16, 8):
        if t <= seq and seq % t == 0:
            return t
    return seq


def conditional_embeddings_fwd(input_ids, condition_ids, params):
    bs, seq = input_ids.shape
    dim = params["word_emb"].shape[1]

    # Tiny (bs x cond_dims) gather stays in the wrapper — negligible traffic.
    cond_embed = jnp.take(params["cond_emb"], condition_ids, axis=0)       # (bs, cond_dims)

    # gamma/beta for all batches, computed once.
    gamma, beta = _cond_affine(cond_embed, params["w_hidden"],
                               params["w_gamma"], params["w_beta"],
                               params["clngma"], params["clnbta"])         # (bs, dim) each

    tile = _pick_row_tile(seq)
    n_tiles = seq // tile

    kernel = functools.partial(_stream_kernel, tile)

    out = pl.pallas_call(
        kernel,
        out_shape=jax.ShapeDtypeStruct((bs, seq, dim), jnp.float32),
        grid_spec=pltpu.PrefetchScalarGridSpec(
            num_scalar_prefetch=1,                                   # input_ids -> SMEM
            grid=(bs, n_tiles),
            in_specs=[
                pl.BlockSpec(memory_space=pl.ANY),                   # word_emb table stays in HBM
                pl.BlockSpec((tile, dim), lambda b, t, ids: (t, 0)), # pos_emb row tile
                pl.BlockSpec((1, dim), lambda b, t, ids: (b, 0)),    # gamma[b]
                pl.BlockSpec((1, dim), lambda b, t, ids: (b, 0)),    # beta[b]
            ],
            out_specs=pl.BlockSpec((None, tile, dim),
                                   lambda b, t, ids: (b, t, 0)),
            scratch_shapes=[
                pltpu.VMEM((tile, dim), jnp.float32),                # gathered word rows
                pltpu.SemaphoreType.DMA((tile,)),                    # per-row gather sems
            ],
        ),
        # Fine-grained 2-D parallel grid so both v7x TensorCores can stream.
        compiler_params=pltpu.CompilerParams(
            dimension_semantics=("parallel", "parallel")),
    )(input_ids.astype(jnp.int32), params["word_emb"], params["pos_emb"],
      gamma, beta)

    # self.dropout(...) is identity at inference.
    return out


if __name__ == "__main__":
    key = jax.random.PRNGKey(0)
    bs, seq, dim = 2, 8, 128          # dim == hidden_units (required for the broadcast)
    vocab, max_pos = 64, 16
    cond_size, cond_dims = 6, 32
    pad_token_id = 0

    ks = jax.random.split(key, 8)
    params = {
        # nn.Embedding tables (deterministic synthetic init; pad row zeroed below)
        "word_emb": jax.random.normal(ks[0], (vocab, dim), jnp.float32) * 0.02,
        "pos_emb":  jax.random.normal(ks[1], (max_pos, dim), jnp.float32) * 0.02,
        "cond_emb": jax.random.normal(ks[2], (cond_size, cond_dims), jnp.float32) * 0.02,
        # Linear weights stored as (in_features, out_features).  The PyTorch
        # module zero-inits clngma_dense/clnbta_dense; small random values here
        # so the conditional path is actually exercised.
        "w_hidden": jax.random.normal(ks[3], (cond_dims, dim), jnp.float32) * 0.05,
        "w_gamma":  jax.random.normal(ks[4], (dim, dim), jnp.float32) * 0.05,
        "w_beta":   jax.random.normal(ks[5], (dim, dim), jnp.float32) * 0.05,
        "clngma": jnp.ones((dim,), jnp.float32),
        "clnbta": jnp.zeros((dim,), jnp.float32),
    }
    # nn.Embedding(padding_idx=pad_token_id): pad row is zero.
    params["word_emb"] = params["word_emb"].at[pad_token_id].set(0.0)

    input_ids = jax.random.randint(ks[6], (bs, seq), 0, vocab)
    condition_ids = jax.random.randint(ks[7], (bs,), 0, cond_size)

    out = conditional_embeddings_fwd(input_ids, condition_ids, params)
    out = jax.block_until_ready(out)

    # pure-JAX reference for correctness
    we = jnp.take(params["word_emb"], input_ids, axis=0)
    pe = params["pos_emb"][:seq][None]
    ce = jnp.take(params["cond_emb"], condition_ids, axis=0)
    h = ce @ params["w_hidden"]
    gamma_ref = params["clngma"] + h @ params["w_gamma"]
    beta_ref = params["clnbta"] + h @ params["w_beta"]
    ref = (we + pe) * gamma_ref[:, None, :] + beta_ref[:, None, :]

    assert out.shape == (bs, seq, dim)
    assert jnp.allclose(out, ref, atol=1e-5, rtol=1e-5), \
        float(jnp.max(jnp.abs(out - ref)))
    print("KERNEL_OK")
</pallas_src>

<mosaic_0001>
module attributes {stable_mosaic.version = 11 : i64} {
  func.func @_cond_affine_kernel(%arg0: memref<2x32xf32, #tpu.memory_space<vmem>>, %arg1: memref<32x128xf32, #tpu.memory_space<vmem>>, %arg2: memref<128x128xf32, #tpu.memory_space<vmem>>, %arg3: memref<128x128xf32, #tpu.memory_space<vmem>>, %arg4: memref<1x128xf32, #tpu.memory_space<vmem>>, %arg5: memref<1x128xf32, #tpu.memory_space<vmem>>, %arg6: memref<2x128xf32, #tpu.memory_space<vmem>>, %arg7: memref<2x128xf32, #tpu.memory_space<vmem>>) attributes {dimension_semantics = [], scalar_prefetch = 0 : i64, scratch_operands = 0 : i64, tpu.core_type = #tpu.core_type<tc>} {
    %c0 = arith.constant 0 : index
    %c0_0 = arith.constant 0 : index
    %0 = vector.load %arg0[%c0, %c0_0] : memref<2x32xf32, #tpu.memory_space<vmem>>, vector<2x32xf32>
    %c0_1 = arith.constant 0 : index
    %c0_2 = arith.constant 0 : index
    %1 = vector.load %arg1[%c0_1, %c0_2] : memref<32x128xf32, #tpu.memory_space<vmem>>, vector<32x128xf32>
    %cst = arith.constant dense<0.000000e+00> : vector<2x128xf32>
    %2 = tpu.matmul %0, %1, %cst {dimension_numbers = #tpu.dot_dimension_numbers<[1], [0], [0], [1], [0, 0, 1, 1], [], []>} : vector<2x32xf32>, vector<32x128xf32>, vector<2x128xf32> -> vector<2x128xf32>
    %c0_3 = arith.constant 0 : index
    %c0_4 = arith.constant 0 : index
    %3 = vector.load %arg4[%c0_3, %c0_4] : memref<1x128xf32, #tpu.memory_space<vmem>>, vector<1x128xf32>
    %c0_5 = arith.constant 0 : index
    %c0_6 = arith.constant 0 : index
    %4 = vector.load %arg2[%c0_5, %c0_6] : memref<128x128xf32, #tpu.memory_space<vmem>>, vector<128x128xf32>
    %cst_7 = arith.constant dense<0.000000e+00> : vector<2x128xf32>
    %5 = tpu.matmul %2, %4, %cst_7 {dimension_numbers = #tpu.dot_dimension_numbers<[1], [0], [0], [1], [0, 0, 1, 1], [], []>} : vector<2x128xf32>, vector<128x128xf32>, vector<2x128xf32> -> vector<2x128xf32>
    %6 = vector.broadcast %3 : vector<1x128xf32> to vector<2x128xf32>
    %7 = arith.addf %6, %5 : vector<2x128xf32>
    %c0_8 = arith.constant 0 : index
    %c0_9 = arith.constant 0 : index
    %8 = vector.load %arg6[%c0_8, %c0_9] : memref<2x128xf32, #tpu.memory_space<vmem>>, vector<2x128xf32>
    tpu.vector_store %arg6[%c0_8, %c0_9], %7 {strides = array<i32>} : memref<2x128xf32, #tpu.memory_space<vmem>>, vector<2x128xf32>,
    %c0_10 = arith.constant 0 : index
    %c0_11 = arith.constant 0 : index
    %9 = vector.load %arg5[%c0_10, %c0_11] : memref<1x128xf32, #tpu.memory_space<vmem>>, vector<1x128xf32>
    %c0_12 = arith.constant 0 : index
    %c0_13 = arith.constant 0 : index
    %10 = vector.load %arg3[%c0_12, %c0_13] : memref<128x128xf32, #tpu.memory_space<vmem>>, vector<128x128xf32>
    %cst_14 = arith.constant dense<0.000000e+00> : vector<2x128xf32>
    %11 = tpu.matmul %2, %10, %cst_14 {dimension_numbers = #tpu.dot_dimension_numbers<[1], [0], [0], [1], [0, 0, 1, 1], [], []>} : vector<2x128xf32>, vector<128x128xf32>, vector<2x128xf32> -> vector<2x128xf32>
    %12 = vector.broadcast %9 : vector<1x128xf32> to vector<2x128xf32>
    %13 = arith.addf %12, %11 : vector<2x128xf32>
    %c0_15 = arith.constant 0 : index
    %c0_16 = arith.constant 0 : index
    %14 = vector.load %arg7[%c0_15, %c0_16] : memref<2x128xf32, #tpu.memory_space<vmem>>, vector<2x128xf32>
    tpu.vector_store %arg7[%c0_15, %c0_16], %13 {strides = array<i32>} : memref<2x128xf32, #tpu.memory_space<vmem>>, vector<2x128xf32>,
    return
  }
}

</mosaic_0001>

<bundles_post_ra>
// kernel: tpu_custom_call.1
= control target key start
LH: loop header
LB: loop body
LE: loop exit
PB: predicated region body
PF: predicated region fallthrough
CT: control target
= control target key end

     0   :  { %13 = vsyncpa [#allocation3], 0  ;;  %s473_s0 = inlined_call_operand.hbm [shape: f32[2,32], index: 0, kind: input, shape index: {}]   ;;  %s474_s1 = inlined_call_operand.hbm [shape: f32[32,128], index: 1, kind: input, shape index: {}]   ;;  %s475_s2 = inlined_call_operand.hbm [shape: f32[128,128], index: 2, kind: input, shape index: {}]   ;;  %s476_s3 = inlined_call_operand.hbm [shape: f32[128,128], index: 3, kind: input, shape index: {}]   ;;  %s477_s4 = inlined_call_operand.vmem [shape: f32[1,128], index: 4, kind: input, shape index: {}]   ;;  %s478_s5 = inlined_call_operand.vmem [shape: f32[1,128], index: 5, kind: input, shape index: {}]   ;;  %s479_s6 = inlined_call_operand.hbm [shape: f32[2,128], index: 6, kind: output, shape index: {0}]   ;;  %s480_s7 = inlined_call_operand.hbm [shape: f32[2,128], index: 7, kind: output, shape index: {1}]  }
   0x1   :  { %14 = vsyncpa [#allocation6], 0 }
   0x2   :  { %15 = vsyncpa [#allocation9], 0 }
   0x3   :  { %16 = vsyncpa [#allocation4], 0  ;;  %s33_s26 = sshll.u32 %s474_s1, 4  ;;  %s34_s26 = int_to_ptr.hbm [resolvable:$true] %s33_s26 }
   0x4   :  { %17 = vsyncpa [#allocation12], 0  ;;  %s401_s27 = smov [#allocation5]   ;;  %s23_s8 = sshll.u32 %s473_s0, 4  ;;  %s24_s8 = int_to_ptr.hbm [resolvable:$true] %s23_s8 }
   0x5   :  { %s35_s28 = sshll.u32 %s401_s27, 4  ;;  %s402_s9 = smov 128   ;;  %s36_s28 = int_to_ptr.vmem [resolvable:$true] %s35_s28 }
   0x6   :  { %s403_s10 = smov 8   ;;  %s404_s11 = smov [#allocation2]  }
   0x7   :  { %41 = dma.hbm_to_vmem [thread:$0]  %s34_s26, 512, %s36_s28, [#allocation6], %s402_s9, %s402_s9, %s403_s10  }
   0x8   :  { %s25_s12 = sshll.u32 %s404_s11, 4  ;;  %s46_s15 = sshll.u32 %s475_s2, 4  ;;  %s26_s12 = int_to_ptr.vmem [resolvable:$true] %s25_s12  ;;  %s47_s15 = int_to_ptr.hbm [resolvable:$true] %s46_s15 }
   0x9   :  { %28 = dma.hbm_to_vmem [thread:$0]  %s24_s8, 32, %s26_s12, [#allocation3]  }
   0xa   :  { %s59_s17 = sshll.u32 %s476_s3, 4  ;;  %s405_s18 = smov [#allocation7]   ;;  %s60_s17 = int_to_ptr.hbm [resolvable:$true] %s59_s17 }
   0xb   :  { %s48_s19 = sshll.u32 %s405_s18, 4  ;;  %s406_s0 = smov [#allocation8]   ;;  %s49_s19 = int_to_ptr.vmem [resolvable:$true] %s48_s19 }
   0xc   :  { %54 = dma.hbm_to_vmem [thread:$0]  %s47_s15, 2048, %s49_s19, [#allocation6], %s402_s9, %s402_s9, %s403_s10  }
   0xd   :  { %s61_s20 = sshll.u32 %s406_s0, 4  ;;  %s62_s20 = int_to_ptr.vmem [resolvable:$true] %s61_s20 }
   0xe   :  { %67 = dma.hbm_to_vmem [thread:$0]  %s60_s17, 2048, %s62_s20, [#allocation9], %s402_s9, %s402_s9, %s403_s10  }
   0xf   :  { %391 = dma.done.wait [#allocation3], 32  }
  0x10   :  { %392 = vsyncadd [#allocation3], 4294967264 }
  0x11   :  { %393 = dma.done.wait [#allocation6], 2560  }
  0x12   :  { %394 = vsyncadd [#allocation6], 4294964736 }
  0x13   :  { %395 = dma.done.wait [#allocation9], 2048  }
  0x14   :  { %396 = vsyncadd [#allocation9], 4294965248  ;;  %v92_v0 = vld [vmem:[#allocation5 + $0x18] sm:$0xff]  ;;  %v91_v1 = vld [vmem:[#allocation5 + $0x10] sm:$0xff]  ;;  %vm93_vm0 = vcmask 261120   ;;  %s407_s21 = smov [#allocation10]  }
  0x15   :  { %109 = vmatpush.msra.mxu0 %v92_v0  ;;  %v90_v2 = vld [vmem:[#allocation5 + $0x8] sm:$0xff]  ;;  %v133_v3 = vld [vmem:[#allocation7 + $0x78] sm:$0xff]  ;;  %v132_v5 = vld [vmem:[#allocation7 + $0x70] sm:$0xff]  ;;  %s206_s22 = sshll.u32 %s407_s21, 4  ;;  %s208_s25 = sshll.u32 %s479_s6, 4  ;;  %s207_s22 = int_to_ptr.vmem [resolvable:$true] %s206_s22  ;;  %s209_s25 = int_to_ptr.hbm [resolvable:$true] %s208_s25 }
  0x16   :  { %134 = vmatpush.msra.mxu1 %v133_v3  ;;  %v175_v4 = vld [vmem:[#allocation8 + $0x78] sm:$0xff]  ;;  %v174_v6 = vld [vmem:[#allocation8 + $0x70] sm:$0xff]  ;;  %v131_v7 = vld [vmem:[#allocation7 + $0x68] sm:$0xff]  ;;  %s408_s28 = smov [#allocation11]  }
  0x17   :  { %110 = vmatpush.msra.mxu0 %v91_v1  ;;  %176 = vmatpush.msra.mxu2 %v175_v4  ;;  %v89_v8 = vld [vmem:[#allocation5] sm:$0xff]  ;;  %v173_v9 = vld [vmem:[#allocation8 + $0x68] sm:$0xff]  ;;  %v88_v10 = vld [vmem:[#allocation2] sm:$0x3]  ;;  %s217_s29 = sshll.u32 %s408_s28, 4  ;;  %s218_s29 = int_to_ptr.vmem [resolvable:$true] %s217_s29 }
  0x18   :  { %135 = vmatpush.msra.mxu1 %v132_v5  ;;  %v130_v11 = vld [vmem:[#allocation7 + $0x60] sm:$0xff]  ;;  %v129_v13 = vld [vmem:[#allocation7 + $0x58] sm:$0xff]  ;;  %v128_v15 = vld [vmem:[#allocation7 + $0x50] sm:$0xff] }
  0x19   :  { %111 = vmatpush.msra.mxu0 %v90_v2  ;;  %177 = vmatpush.msra.mxu2 %v174_v6  ;;  %v172_v12 = vld [vmem:[#allocation8 + $0x60] sm:$0xff]  ;;  %v171_v14 = vld [vmem:[#allocation8 + $0x58] sm:$0xff]  ;;  %v170_v16 = vld [vmem:[#allocation8 + $0x50] sm:$0xff] }
  0x1a   :  { %136 = vmatpush.msra.mxu1 %v131_v7  ;;  %v127_v17 = vld [vmem:[#allocation7 + $0x48] sm:$0xff]  ;;  %v126_v19 = vld [vmem:[#allocation7 + $0x40] sm:$0xff]  ;;  %v125_v21 = vld [vmem:[#allocation7 + $0x38] sm:$0xff] }
  0x1b   :  { %112 = vmatpush.msra.mxu0 %v89_v8  ;;  %178 = vmatpush.msra.mxu2 %v173_v9  ;;  %v169_v18 = vld [vmem:[#allocation8 + $0x48] sm:$0xff]  ;;  %v168_v20 = vld [vmem:[#allocation8 + $0x40] sm:$0xff]  ;;  %v167_v22 = vld [vmem:[#allocation8 + $0x38] sm:$0xff] }
  0x1c   :  { %236 = vmatmul.msk.f32.vlgmr.msra.gmra.mxu0 %vm93_vm0, %v88_v10  ;;  %137 = vmatpush.msra.mxu1 %v130_v11  ;;  %v124_v23 = vld [vmem:[#allocation7 + $0x30] sm:$0xff]  ;;  %v123_v25 = vld [vmem:[#allocation7 + $0x28] sm:$0xff]  ;;  %v122_v27 = vld [vmem:[#allocation7 + $0x20] sm:$0xff] }
  0x1d   :  { %179 = vmatpush.msra.mxu2 %v172_v12  ;;  %v166_v24 = vld [vmem:[#allocation8 + $0x30] sm:$0xff]  ;;  %v165_v26 = vld [vmem:[#allocation8 + $0x28] sm:$0xff]  ;;  %v164_v28 = vld [vmem:[#allocation8 + $0x20] sm:$0xff] }
  0x1e   :  { %138 = vmatpush.msra.mxu1 %v129_v13  ;;  %v121_v29 = vld [vmem:[#allocation7 + $0x18] sm:$0xff]  ;;  %v120_v31 = vld [vmem:[#allocation7 + $0x10] sm:$0xff]  ;;  %v119_v33 = vld [vmem:[#allocation7 + $0x8] sm:$0xff] }
  0x1f   :  { %180 = vmatpush.msra.mxu2 %v171_v14  ;;  %v163_v30 = vld [vmem:[#allocation8 + $0x18] sm:$0xff]  ;;  %v162_v32 = vld [vmem:[#allocation8 + $0x10] sm:$0xff]  ;;  %v161_v34 = vld [vmem:[#allocation8 + $0x8] sm:$0xff] }
  0x20   :  { %139 = vmatpush.msra.mxu1 %v128_v15  ;;  %v118_v35 = vld [vmem:[#allocation7] sm:$0xff]  ;;  %v245_v38 = vld [vmem:[%s477_s4] ss:$0 sm:$0xff]  ;;  %s219_s4 = sshll.u32 %s480_s7, 4  ;;  %s220_s4 = int_to_ptr.hbm [resolvable:$true] %s219_s4 }
  0x21   :  { %181 = vmatpush.msra.mxu2 %v170_v16  ;;  %v160_v36 = vld [vmem:[#allocation8] sm:$0xff]  ;;  %v246_v41 = vld [vmem:[%s478_s5] ss:$0 sm:$0xff] }
  0x22   :  { %140 = vmatpush.msra.mxu1 %v127_v17 }
  0x23   :  { %182 = vmatpush.msra.mxu2 %v169_v18 }
  0x24   :  { %141 = vmatpush.msra.mxu1 %v126_v19 }
  0x25   :  { %183 = vmatpush.msra.mxu2 %v168_v20 }
  0x26   :  { %142 = vmatpush.msra.mxu1 %v125_v21 }
  0x27   :  { %184 = vmatpush.msra.mxu2 %v167_v22 }
  0x28   :  { %143 = vmatpush.msra.mxu1 %v124_v23 }
  0x29   :  { %185 = vmatpush.msra.mxu2 %v166_v24 }
  0x2a   :  { %144 = vmatpush.msra.mxu1 %v123_v25 }
  0x2b   :  { %186 = vmatpush.msra.mxu2 %v165_v26 }
  0x2c   :  { %145 = vmatpush.msra.mxu1 %v122_v27 }
  0x2d   :  { %187 = vmatpush.msra.mxu2 %v164_v28 }
  0x2e   :  { %146 = vmatpush.msra.mxu1 %v121_v29 }
  0x2f   :  { %188 = vmatpush.msra.mxu2 %v163_v30 }
  0x30   :  { %147 = vmatpush.msra.mxu1 %v120_v31 }
  0x31   :  { %189 = vmatpush.msra.mxu2 %v162_v32 }
  0x32   :  { %148 = vmatpush.msra.mxu1 %v119_v33 }
  0x33   :  { %190 = vmatpush.msra.mxu2 %v161_v34 }
  0x34   :  { %149 = vmatpush.msra.mxu1 %v118_v35 }
  0x35   :  { %191 = vmatpush.msra.mxu2 %v160_v36 }
  0x99   :  { %v114_v37 = vpop.f32.mrf.mxu0 }
  0x9a   :  { %150 = vmatmul.f32.vlgmr.msra.gmra.mxu1 %v114_v37  ;;  %192 = vmatmul.f32.vlgmr.msra.gmra.mxu2 %v114_v37 }
 0x117   :  { %v151_v39 = vpop.f32.mrf.mxu1 }
 0x118   :  { %v157_v40 = vadd.f32 %v245_v38, %v151_v39 }
 0x11a   :  { %158 = vst [vmem:[#allocation10] sm:$0x3] %v157_v40 }
 0x11b   :  { %211 = dma.vmem_to_hbm [thread:$0]  %s207_s22, 32, %s209_s25, [#allocation4]  }
 0x11d   :  { %v193_v42 = vpop.f32.mrf.mxu2 }
 0x11e   :  { %v199_v43 = vadd.f32 %v246_v41, %v193_v42 }
 0x120   :  { %200 = vst [vmem:[#allocation11] sm:$0x3] %v199_v43 }
 0x121   :  { %222 = dma.vmem_to_hbm [thread:$0]  %s218_s29, 32, %s220_s4, [#allocation12]  }
 0x122   :  { %397 = dma.done.wait [#allocation4], 32  }
 0x123   :  { %398 = vsyncadd [#allocation4], 4294967264 }
 0x124   :  { %399 = dma.done.wait [#allocation12], 32  }
 0x125   :  { %400 = vsyncadd [#allocation12], 4294967264 }
 0x126   :  { %231 = vsyncpa [#allocation3], 1 }
 0x127   :  { %232 = vsyncpa [#allocation6], 1 }
 0x128   :  { %233 = vsyncpa [#allocation9], 1 }
 0x129   :  { %234 = vsyncpa [#allocation4], 1 }
 0x12a   :  { %235 = vsyncpa [#allocation12], 1 }

</bundles_post_ra>
